<compile_context>
chip_gen: v7x
topology: tpu7x:2x2x1
jax: 0.10.0
libtpu: 0.0.40
codegen_flags: <defaults>
</compile_context>

<pallas_src>
import math
import functools

import jax
import jax.numpy as jnp
from jax import lax
from jax.experimental import pallas as pl
from jax.experimental.pallas import tpu as pltpu

_LANE = 128
_SUBLANE = 8
_MAX_TILE_B = 512  # keeps h = (TILE_B, H_pad) f32 VMEM/vreg-friendly on all chips


def _round_up(x, m):
    return ((x + m - 1) // m) * m


def _mlp_kernel(x_ref, w1_ref, b1_ref, w2_ref, b2_ref, o_ref):
    # Layer 1: x[tB, S] . w1[Hp, S], contracting S with S (transposed-RHS contraction,
    # native on the MXU). bf16 operands, f32 accumulation.
    x = x_ref[...].astype(jnp.bfloat16)
    h = lax.dot_general(
        x, w1_ref[...],
        dimension_numbers=(((1,), (1,)), ((), ())),
        preferred_element_type=jnp.float32,
    )
    # Bias + leaky_relu (negative_slope=0.01, the F.leaky_relu default) in f32 on the VPU.
    h = h + b1_ref[...]                       # b1 is (1, Hp) -> broadcasts over the batch tile
    h = jnp.where(h > 0, h, 0.01 * h)
    # Layer 2: h[tB, Hp] . w2[Ap, Hp], contracting Hp with Hp.
    out = lax.dot_general(
        h.astype(jnp.bfloat16), w2_ref[...],
        dimension_numbers=(((1,), (1,)), ((), ())),
        preferred_element_type=jnp.float32,
    )
    out = out + b2_ref[...]                   # b2 is (1, Ap)
    o_ref[...] = out.astype(o_ref.dtype)


def prepare_params(w1, b1, w2, b2):
    """One-time parameter prep (analogous to moving the nn.Module to device):
    zero-pad hidden/action dims up to multiples of 128 and cast weights to bf16."""
    H, S = w1.shape
    A, H2 = w2.shape
    assert H2 == H
    Hp = _round_up(H, _LANE)
    Ap = _round_up(A, _LANE)
    w1p = jnp.zeros((Hp, S), jnp.bfloat16).at[:H, :].set(w1.astype(jnp.bfloat16))
    b1p = jnp.zeros((1, Hp), jnp.float32).at[:, :H].set(b1.astype(jnp.float32))
    w2p = jnp.zeros((Ap, Hp), jnp.bfloat16).at[:A, :H].set(w2.astype(jnp.bfloat16))
    b2p = jnp.zeros((1, Ap), jnp.float32).at[:, :A].set(b2.astype(jnp.float32))
    return w1p, b1p, w2p, b2p


@functools.partial(jax.jit, static_argnames=("action_dim",))
def network_forward(x, w1p, b1p, w2p, b2p, *, action_dim):
    """x: (B, state_dim) or (state_dim,) f32. Params from prepare_params.
    Returns (B, action_dim) (or (action_dim,) for a single state)."""
    squeeze = x.ndim == 1
    if squeeze:                               # single-state act() call
        x = x[None, :]
    B, S = x.shape
    Hp = w1p.shape[0]
    Ap = w2p.shape[0]

    # Batch tiling: big tiles amortize the ~0.35us/grid-step overhead; cap keeps the
    # working set tiny vs VMEM (v7x: 64 MiB physical / 32 MiB scoped default).
    tile_b = min(_MAX_TILE_B, _round_up(B, _SUBLANE))
    b_pad = _round_up(B, tile_b)
    if b_pad != B:
        x = jnp.pad(x, ((0, b_pad - B), (0, 0)))

    grid = (b_pad // tile_b,)

    flops = 2 * b_pad * (S * Hp + Hp * Ap)
    bytes_accessed = (
        b_pad * S * 4                        # streamed input (f32)
        + (w1p.size + w2p.size) * 2          # bf16 weights (read once)
        + (b1p.size + b2p.size) * 4          # f32 biases
        + b_pad * Ap * 4                     # output (f32)
    )

    out = pl.pallas_call(
        _mlp_kernel,
        out_shape=jax.ShapeDtypeStruct((b_pad, Ap), x.dtype),
        grid_spec=pltpu.PrefetchScalarGridSpec(
            num_scalar_prefetch=0,
            grid=grid,
            in_specs=[
                pl.BlockSpec((tile_b, S), lambda i: (i, 0)),   # x: pipelined per batch tile
                pl.BlockSpec((Hp, S), lambda i: (0, 0)),       # w1: VMEM-resident
                pl.BlockSpec((1, Hp), lambda i: (0, 0)),       # b1: VMEM-resident
                pl.BlockSpec((Ap, Hp), lambda i: (0, 0)),      # w2: VMEM-resident
                pl.BlockSpec((1, Ap), lambda i: (0, 0)),       # b2: VMEM-resident
            ],
            out_specs=pl.BlockSpec((tile_b, Ap), lambda i: (i, 0)),
        ),
        compiler_params=pltpu.CompilerParams(
            dimension_semantics=("parallel",),                 # shard batch tiles across TCs
        ),
        cost_estimate=pl.CostEstimate(
            flops=flops, transcendentals=0, bytes_accessed=bytes_accessed),
    )(x, w1p, b1p, w2p, b2p)

    # Strip batch + lane padding.
    out = out[:B, :action_dim]
    return out[0] if squeeze else out


def _init_linear(key, out_features, in_features):
    # Deterministic init mimicking PyTorch nn.Linear default: U(-1/sqrt(fan_in), 1/sqrt(fan_in))
    kw, kb = jax.random.split(key)
    bound = 1.0 / math.sqrt(in_features)
    w = jax.random.uniform(kw, (out_features, in_features), jnp.float32, -bound, bound)
    b = jax.random.uniform(kb, (out_features,), jnp.float32, -bound, bound)
    return w, b


def _reference_f32(x, w1, b1, w2, b2):
    # Full-f32 PyTorch-equivalent forward.
    h = x @ w1.T + b1
    h = jnp.where(h > 0, h, 0.01 * h)
    return h @ w2.T + b2


def _reference_bf16(x, w1, b1, w2, b2):
    # Reference matching the kernel math exactly (bf16 MXU operands, f32 accumulation).
    xb = x.astype(jnp.bfloat16)
    h = jnp.dot(xb, w1.astype(jnp.bfloat16).T, preferred_element_type=jnp.float32) + b1
    h = jnp.where(h > 0, h, 0.01 * h)
    return jnp.dot(h.astype(jnp.bfloat16), w2.astype(jnp.bfloat16).T,
                   preferred_element_type=jnp.float32) + b2


if __name__ == "__main__":
    # Small shapes consistent with the module's forward (state -> hidden -> action).
    batch, state_dim, hidden_dim, action_dim = 8, 16, 32, 4

    key = jax.random.PRNGKey(0)
    kx, k1, k2, kx2 = jax.random.split(key, 4)

    x = jax.random.normal(kx, (batch, state_dim), jnp.float32)
    w1, b1 = _init_linear(k1, hidden_dim, state_dim)   # self.hidden
    w2, b2 = _init_linear(k2, action_dim, hidden_dim)  # self.output

    params = prepare_params(w1, b1, w2, b2)            # one-time (like .to(device))

    # --- check 1: small batch, single grid step ---
    out = network_forward(x, *params, action_dim=action_dim)
    jax.block_until_ready(out)
    assert out.shape == (batch, action_dim)
    assert jnp.allclose(out, _reference_bf16(x, w1, b1, w2, b2),
                        atol=2e-3, rtol=2e-3), "mismatch vs bf16 reference"
    assert jnp.allclose(out, _reference_f32(x, w1, b1, w2, b2),
                        atol=3e-2, rtol=3e-2), "mismatch vs f32 reference"

    # --- check 2: larger, non-aligned batch -> exercises batch padding + multi-tile grid ---
    big_batch = 1030
    x_big = jax.random.normal(kx2, (big_batch, state_dim), jnp.float32)
    out_big = network_forward(x_big, *params, action_dim=action_dim)
    jax.block_until_ready(out_big)
    assert out_big.shape == (big_batch, action_dim)
    assert jnp.allclose(out_big, _reference_bf16(x_big, w1, b1, w2, b2),
                        atol=2e-3, rtol=2e-3), "mismatch vs bf16 reference (big batch)"

    # --- check 3: single-state (1-D) input, like an act() call ---
    out_one = network_forward(x[0], *params, action_dim=action_dim)
    jax.block_until_ready(out_one)
    assert out_one.shape == (action_dim,)
    assert jnp.allclose(out_one, out[0], atol=1e-5, rtol=1e-5), "1-D path mismatch"

    print("KERNEL_OK")
</pallas_src>

<mosaic_0001>
module attributes {stable_mosaic.version = 11 : i64} {
  func.func @_mlp_kernel(%arg0: i32, %arg1: memref<8x16xf32, #tpu.memory_space<vmem>>, %arg2: memref<128x16xbf16, #tpu.memory_space<vmem>>, %arg3: memref<1x128xf32, #tpu.memory_space<vmem>>, %arg4: memref<128x128xbf16, #tpu.memory_space<vmem>>, %arg5: memref<1x128xf32, #tpu.memory_space<vmem>>, %arg6: memref<8x128xf32, #tpu.memory_space<vmem>>) attributes {dimension_semantics = [#tpu.dimension_semantics<parallel>], iteration_bounds = array<i64: 1>, scalar_prefetch = 0 : i64, scratch_operands = 0 : i64, tpu.core_type = #tpu.core_type<tc>, window_params = [{transform_indices = @transform_0, window_bounds = array<i64: 8, 16>}, {pipeline_mode = #tpu.pipeline_mode<synchronous>, transform_indices = @transform_1, window_bounds = array<i64: 128, 16>}, {pipeline_mode = #tpu.pipeline_mode<synchronous>, transform_indices = @transform_2, window_bounds = array<i64: 1, 128>}, {pipeline_mode = #tpu.pipeline_mode<synchronous>, transform_indices = @transform_3, window_bounds = array<i64: 128, 128>}, {pipeline_mode = #tpu.pipeline_mode<synchronous>, transform_indices = @transform_4, window_bounds = array<i64: 1, 128>}, {transform_indices = @transform_5, window_bounds = array<i64: 8, 128>}]} {
    %c0 = arith.constant 0 : index
    %c0_0 = arith.constant 0 : index
    %0 = vector.load %arg1[%c0, %c0_0] : memref<8x16xf32, #tpu.memory_space<vmem>>, vector<8x16xf32>
    %1 = arith.truncf %0 : vector<8x16xf32> to vector<8x16xbf16>
    %c0_1 = arith.constant 0 : index
    %c0_2 = arith.constant 0 : index
    %2 = vector.load %arg2[%c0_1, %c0_2] : memref<128x16xbf16, #tpu.memory_space<vmem>>, vector<128x16xbf16>
    %cst = arith.constant dense<0.000000e+00> : vector<8x128xf32>
    %3 = tpu.matmul %1, %2, %cst {dimension_numbers = #tpu.dot_dimension_numbers<[1], [1], [0], [0], [0, 0, 1, 0], [], []>} : vector<8x16xbf16>, vector<128x16xbf16>, vector<8x128xf32> -> vector<8x128xf32>
    %c0_3 = arith.constant 0 : index
    %c0_4 = arith.constant 0 : index
    %4 = vector.load %arg3[%c0_3, %c0_4] : memref<1x128xf32, #tpu.memory_space<vmem>>, vector<1x128xf32>
    %5 = vector.broadcast %4 : vector<1x128xf32> to vector<8x128xf32>
    %6 = arith.addf %3, %5 : vector<8x128xf32>
    %cst_5 = arith.constant 0.000000e+00 : f32
    %7 = vector.broadcast %cst_5 : f32 to vector<8x128xf32>
    %8 = arith.cmpf ogt, %6, %7 : vector<8x128xf32>
    %cst_6 = arith.constant 0.00999999977 : f32
    %9 = vector.broadcast %cst_6 : f32 to vector<8x128xf32>
    %10 = arith.mulf %9, %6 : vector<8x128xf32>
    %11 = arith.select %8, %6, %10 : vector<8x128xi1>, vector<8x128xf32>
    %12 = arith.truncf %11 : vector<8x128xf32> to vector<8x128xbf16>
    %c0_7 = arith.constant 0 : index
    %c0_8 = arith.constant 0 : index
    %13 = vector.load %arg4[%c0_7, %c0_8] : memref<128x128xbf16, #tpu.memory_space<vmem>>, vector<128x128xbf16>
    %cst_9 = arith.constant dense<0.000000e+00> : vector<8x128xf32>
    %14 = tpu.matmul %12, %13, %cst_9 {dimension_numbers = #tpu.dot_dimension_numbers<[1], [1], [0], [0], [0, 0, 1, 0], [], []>} : vector<8x128xbf16>, vector<128x128xbf16>, vector<8x128xf32> -> vector<8x128xf32>
    %c0_10 = arith.constant 0 : index
    %c0_11 = arith.constant 0 : index
    %15 = vector.load %arg5[%c0_10, %c0_11] : memref<1x128xf32, #tpu.memory_space<vmem>>, vector<1x128xf32>
    %16 = vector.broadcast %15 : vector<1x128xf32> to vector<8x128xf32>
    %17 = arith.addf %14, %16 : vector<8x128xf32>
    %c0_12 = arith.constant 0 : index
    %c0_13 = arith.constant 0 : index
    %18 = vector.load %arg6[%c0_12, %c0_13] : memref<8x128xf32, #tpu.memory_space<vmem>>, vector<8x128xf32>
    tpu.vector_store %arg6[%c0_12, %c0_13], %17 {strides = array<i32>} : memref<8x128xf32, #tpu.memory_space<vmem>>, vector<8x128xf32>,
    return
  }
  func.func @transform_0(%arg0: i32) -> (i32, i32) {
    %c0_i32 = arith.constant 0 : i32
    %c0_i32_0 = arith.constant 0 : i32
    return %arg0, %c0_i32 : i32, i32
  }
  func.func @transform_1(%arg0: i32) -> (i32, i32) {
    %c0_i32 = arith.constant 0 : i32
    %c0_i32_0 = arith.constant 0 : i32
    %c0_i32_1 = arith.constant 0 : i32
    return %c0_i32, %c0_i32_0 : i32, i32
  }
  func.func @transform_2(%arg0: i32) -> (i32, i32) {
    %c0_i32 = arith.constant 0 : i32
    %c0_i32_0 = arith.constant 0 : i32
    %c0_i32_1 = arith.constant 0 : i32
    return %c0_i32, %c0_i32_0 : i32, i32
  }
  func.func @transform_3(%arg0: i32) -> (i32, i32) {
    %c0_i32 = arith.constant 0 : i32
    %c0_i32_0 = arith.constant 0 : i32
    %c0_i32_1 = arith.constant 0 : i32
    return %c0_i32, %c0_i32_0 : i32, i32
  }
  func.func @transform_4(%arg0: i32) -> (i32, i32) {
    %c0_i32 = arith.constant 0 : i32
    %c0_i32_0 = arith.constant 0 : i32
    %c0_i32_1 = arith.constant 0 : i32
    return %c0_i32, %c0_i32_0 : i32, i32
  }
  func.func @transform_5(%arg0: i32) -> (i32, i32) {
    %c0_i32 = arith.constant 0 : i32
    %c0_i32_0 = arith.constant 0 : i32
    return %arg0, %c0_i32 : i32, i32
  }
}

</mosaic_0001>

<bundles_post_ra>
// kernel: network_forward.1
= control target key start
LH: loop header
LB: loop body
LE: loop exit
PB: predicated region body
PF: predicated region fallthrough
CT: control target
= control target key end

     0   :  { %vm86_vm0 = vcmask 130048   ;;  %v369_v0 = vmov 0.0   ;;  %vm370_vm1 = vmmov 0   ;;  %s470_s1 = inlined_call_operand.vmem [shape: bf16[128,16], index: 1, kind: input, shape index: {}]   ;;  %s471_s3 = inlined_call_operand.vmem [shape: bf16[128,128], index: 3, kind: input, shape index: {}]   ;;  %s472_s0 = inlined_call_operand.vmem [shape: f32[8,16], index: 0, kind: input, shape index: {}]   ;;  %s473_s2 = inlined_call_operand.vmem [shape: f32[1,128], index: 2, kind: input, shape index: {}]   ;;  %s474_s4 = inlined_call_operand.vmem [shape: f32[1,128], index: 4, kind: input, shape index: {}]   ;;  %s475_s5 = inlined_call_operand.vmem [shape: f32[8,128], index: 5, kind: output, shape index: {}]  }
   0x1   :  { %311 = vmatprep.subr.bf16.mxu0 %v369_v0  ;;  %v353_v1 = vld [vmem:[%s470_s1] sm:$0xff]   ;;  %327 = vmatprep.mubr.msk.bf16.mxu0 %vm370_vm1, %v369_v0  ;;  %v354_v3 = vld [vmem:[%s470_s1 + $0x8] sm:$0xff]   ;;  %v355_v6 = vld [vmem:[%s470_s1 + $0x10] sm:$0xff]  }
   0x2   :  { %331 = vmatprep.subr.bf16.mxu1 %v369_v0  ;;  %347 = vmatprep.mubr.msk.bf16.mxu1 %vm370_vm1, %v369_v0  ;;  %v91_v2 = vsel %vm86_vm0, %v353_v1, 0  ;;  %v94_v4 = vsel %vm86_vm0, %v354_v3, 0  ;;  %v361_v5 = vld [vmem:[%s471_s3] sm:$0xff]   ;;  %v362_v7 = vld [vmem:[%s471_s3 + $0x8] sm:$0xff]   ;;  %v97_v8 = vsel %vm86_vm0, %v355_v6, 0  ;;  %v356_v9 = vld [vmem:[%s470_s1 + $0x18] sm:$0xff]  }
   0x3   :  { %312 = vmatpush3.bf16.xpose.msra.mxu0 %v91_v2  ;;  %332 = vmatpush3.bf16.xpose.msra.mxu1 %v361_v5  ;;  %v363_v10 = vld [vmem:[%s471_s3 + $0x10] sm:$0xff]   ;;  %v100_v11 = vsel %vm86_vm0, %v356_v9, 0  ;;  %v357_v12 = vld [vmem:[%s470_s1 + $0x20] sm:$0xff]   ;;  %v364_v13 = vld [vmem:[%s471_s3 + $0x18] sm:$0xff]  }
   0x4   :  { %313 = vmatprep.subr.bf16.mxu0 %v369_v0  ;;  %333 = vmatprep.subr.bf16.mxu1 %v369_v0  ;;  %v103_v14 = vsel %vm86_vm0, %v357_v12, 0  ;;  %v358_v15 = vld [vmem:[%s470_s1 + $0x28] sm:$0xff]   ;;  %v365_v16 = vld [vmem:[%s471_s3 + $0x20] sm:$0xff]   ;;  %v359_v18 = vld [vmem:[%s470_s1 + $0x30] sm:$0xff]  }
   0x5   :  { %v106_v17 = vsel %vm86_vm0, %v358_v15, 0  ;;  %v366_v19 = vld [vmem:[%s471_s3 + $0x28] sm:$0xff]   ;;  %v109_v20 = vsel %vm86_vm0, %v359_v18, 0  ;;  %v360_v21 = vld [vmem:[%s470_s1 + $0x38] sm:$0xff]   ;;  %v367_v22 = vld [vmem:[%s471_s3 + $0x30] sm:$0xff]  }
   0x6   :  { %v112_v23 = vsel %vm86_vm0, %v360_v21, 0  ;;  %v21_v24 = vld [vmem:[%s472_s0] sm:$0xff]  ;;  %v368_v26 = vld [vmem:[%s471_s3 + $0x38] sm:$0xff]  }
   0x7   :  { %v22_v25 = vpack.c.bf16 %v21_v24, %v21_v24  ;;  %v274_v27 = vld [vmem:[%s473_s2] ss:$0 sm:$0xff] }
   0x8   :  { %v284_v36 = vld [vmem:[%s474_s4] ss:$0 sm:$0xff] }
   0xb   :  { %314 = vmatpush3.bf16.xpose.msra.mxu0 %v94_v4  ;;  %334 = vmatpush3.bf16.xpose.msra.mxu1 %v362_v7 }
   0xc   :  { %315 = vmatprep.subr.bf16.mxu0 %v369_v0  ;;  %335 = vmatprep.subr.bf16.mxu1 %v369_v0 }
  0x13   :  { %316 = vmatpush3.bf16.xpose.msra.mxu0 %v97_v8  ;;  %336 = vmatpush3.bf16.xpose.msra.mxu1 %v363_v10 }
  0x14   :  { %317 = vmatprep.subr.bf16.mxu0 %v369_v0  ;;  %337 = vmatprep.subr.bf16.mxu1 %v369_v0 }
  0x1b   :  { %318 = vmatpush3.bf16.xpose.msra.mxu0 %v100_v11  ;;  %338 = vmatpush3.bf16.xpose.msra.mxu1 %v364_v13 }
  0x1c   :  { %319 = vmatprep.subr.bf16.mxu0 %v369_v0  ;;  %339 = vmatprep.subr.bf16.mxu1 %v369_v0 }
  0x23   :  { %320 = vmatpush3.bf16.xpose.msra.mxu0 %v103_v14  ;;  %340 = vmatpush3.bf16.xpose.msra.mxu1 %v365_v16 }
  0x24   :  { %321 = vmatprep.subr.bf16.mxu0 %v369_v0  ;;  %341 = vmatprep.subr.bf16.mxu1 %v369_v0 }
  0x2b   :  { %322 = vmatpush3.bf16.xpose.msra.mxu0 %v106_v17  ;;  %342 = vmatpush3.bf16.xpose.msra.mxu1 %v366_v19 }
  0x2c   :  { %323 = vmatprep.subr.bf16.mxu0 %v369_v0  ;;  %343 = vmatprep.subr.bf16.mxu1 %v369_v0 }
  0x33   :  { %324 = vmatpush3.bf16.xpose.msra.mxu0 %v109_v20  ;;  %344 = vmatpush3.bf16.xpose.msra.mxu1 %v367_v22 }
  0x34   :  { %325 = vmatprep.subr.bf16.mxu0 %v369_v0  ;;  %345 = vmatprep.subr.bf16.mxu1 %v369_v0 }
  0x3b   :  { %326 = vmatpush3.bf16.xpose.msra.mxu0 %v112_v23  ;;  %346 = vmatpush3.bf16.xpose.msra.mxu1 %v368_v26 }
  0x42   :  { %328 = vmatmul.mubr.msk.bf16.vlgmr.msra.gmra.mrb[0].mxu0 %vm86_vm0, %v22_v25 }
 0x115   :  { %v148_v28 = vpop.f32.mrb[0].mxu0 }
 0x116   :  { %v149_v29 = vadd.f32 %v274_v27, %v148_v28  ;;  %v329_v30 = vpop.f32.mrb[1].mxu0 }
 0x117   :  { %v151_v31 = vpop.f32.mrb[2].mxu0 }
 0x118   :  { %vm154_vm2 = vcmp.gt.f32.partialorder %v149_v29, 0.0  ;;  %v155_v32 = vmul.f32 0.01, %v149_v29  ;;  %v330_v33 = vpop.f32.mrb[3].mxu0 }
 0x11a   :  { %v156_v34 = vsel %vm154_vm2, %v149_v29, %v155_v32 }
 0x11b   :  { %v157_v35 = vpack.c.bf16 %v156_v34, %v156_v34 }
 0x11d   :  { %348 = vmatmul.mubr.bf16.vlgmr.msra.gmra.mrb[0].mxu1 %v157_v35 }
 0x1f0   :  { %v263_v37 = vpop.f32.mrb[0].mxu1 }
 0x1f1   :  { %v264_v38 = vadd.f32 %v284_v36, %v263_v37  ;;  %v349_v39 = vpop.f32.mrb[1].mxu1 }
 0x1f2   :  { %v266_v40 = vpop.f32.mrb[2].mxu1 }
 0x1f3   :  { %269 = vst [vmem:[%s475_s5] sm:$0xff] %v264_v38  ;;  %v350_v41 = vpop.f32.mrb[3].mxu1 }

</bundles_post_ra>
